<compile_context>
chip_gen: v6e
topology: v6e:2x2x1
jax: 0.10.0
libtpu: 0.0.40
codegen_flags: <defaults>
</compile_context>

<pallas_src>
import functools

import jax
import jax.numpy as jnp
from jax.experimental import pallas as pl
from jax.experimental.pallas import tpu as pltpu


# ---------------------------------------------------------------------------
# Kernel
# ---------------------------------------------------------------------------
def _fused_mlp_kernel(*refs, n_layers):
    """Fused multi-layer MLP on one row tile.

    refs = (x_ref, w0_ref, b0_ref, w1_ref, b1_ref, ..., o_ref)
      x_ref : (TM, F0p)      activations for this row tile (padded features)
      wi_ref: (Fip, F(i+1)p) padded weight, already (fan_in, fan_out) layout
      bi_ref: (1,  F(i+1)p)  padded bias
      o_ref : (TM, FLp)      padded output tile
    """
    x_ref = refs[0]
    o_ref = refs[-1]
    wb_refs = refs[1:-1]

    h = x_ref[...]
    for i in range(n_layers):
        w = wb_refs[2 * i][...]
        b = wb_refs[2 * i + 1][...]
        # MXU matmul with f32 accumulation; bias row broadcasts over the tile.
        h = jnp.dot(h, w, preferred_element_type=jnp.float32) + b
        if i != n_layers - 1:
            # nn.LeakyReLU(negative_slope=0.1); output layer is identity.
            h = jnp.where(h >= 0, h, 0.1 * h)
    o_ref[...] = h.astype(o_ref.dtype)


# ---------------------------------------------------------------------------
# Helpers
# ---------------------------------------------------------------------------
def _round_up(x, m):
    return (x + m - 1) // m * m


def init_mlp_params(key, in_features, out_features, hidden_features,
                    hidden_layers, dtype=jnp.float32):
    """Deterministic init mimicking torch.nn.Linear defaults (U[-1/sqrt(fan_in), +]).

    Weights are stored pre-transposed as (fan_in, fan_out) so the kernel does x @ W.
    """
    params = []
    if hidden_layers == 0:
        dims = [(in_features, out_features)]
    else:
        dims = [(in_features, hidden_features)]
        dims += [(hidden_features, hidden_features)] * (hidden_layers - 1)
        dims += [(hidden_features, out_features)]

    for (fan_in, fan_out) in dims:
        key, kw, kb = jax.random.split(key, 3)
        bound = 1.0 / jnp.sqrt(float(fan_in))
        w = jax.random.uniform(kw, (fan_in, fan_out), dtype, -bound, bound)
        b = jax.random.uniform(kb, (fan_out,), dtype, -bound, bound)
        params.append((w, b))
    return params


# ---------------------------------------------------------------------------
# Forward
# ---------------------------------------------------------------------------
def mlp_forward(x, params, *, row_tile=512):
    """MLP.forward: flatten leading dims, run fused Pallas kernel, restore shape."""
    head_shape = x.shape[:-1]
    f_in = x.shape[-1]
    h = x.reshape(-1, f_in)
    n = h.shape[0]
    dtype = x.dtype

    n_layers = len(params)
    out_features = params[-1][0].shape[1]

    # Padded feature dims (lane-dense: multiples of 128).
    dims = [f_in] + [w.shape[1] for (w, _) in params]
    pdims = [_round_up(d, 128) for d in dims]

    # Row tiling: pad rows to a multiple of the tile; tile capped by batch size.
    tm = min(row_tile, _round_up(n, 8))
    n_pad = _round_up(n, tm)

    # Zero-pad activations. Padded feature columns are zero; padded weight rows
    # are zero; padded bias entries are zero -> padding never contaminates the
    # real outputs, and padded output rows/cols are simply sliced off.
    x_pad = jnp.zeros((n_pad, pdims[0]), dtype).at[:n, :f_in].set(h)

    padded_wb = []
    in_specs = [pl.BlockSpec((tm, pdims[0]), lambda i: (i, 0))]
    for (w, b), pi, po in zip(params, pdims[:-1], pdims[1:]):
        wp = jnp.zeros((pi, po), dtype).at[:w.shape[0], :w.shape[1]].set(w)
        bp = jnp.zeros((1, po), dtype).at[0, :b.shape[0]].set(b)
        padded_wb.extend([wp, bp])
        # Weights/biases: constant block index -> resident in VMEM across grid.
        in_specs.append(pl.BlockSpec((pi, po), lambda i: (0, 0)))
        in_specs.append(pl.BlockSpec((1, po), lambda i: (0, 0)))

    out_padded = pl.pallas_call(
        functools.partial(_fused_mlp_kernel, n_layers=n_layers),
        out_shape=jax.ShapeDtypeStruct((n_pad, pdims[-1]), dtype),
        grid=(n_pad // tm,),
        in_specs=in_specs,
        out_specs=pl.BlockSpec((tm, pdims[-1]), lambda i: (i, 0)),
        compiler_params=pltpu.CompilerParams(
            # Row tiles are independent -> shard across TCs on v7x.
            dimension_semantics=("parallel",),
        ),
    )(x_pad, *padded_wb)

    out = out_padded[:n, :out_features]
    return out.reshape(*head_shape, out_features)


# ---------------------------------------------------------------------------
# Demo / correctness check
# ---------------------------------------------------------------------------
if __name__ == "__main__":
    # Small config consistent with the module: in=16, hidden=32, layers=2, out=8
    in_features, out_features = 16, 8
    hidden_features, hidden_layers = 32, 2

    key = jax.random.PRNGKey(0)
    key, kx = jax.random.split(key)
    x = jax.random.normal(kx, (2, 4, in_features), dtype=jnp.float32)  # head_shape=(2,4)

    params = init_mlp_params(key, in_features, out_features,
                             hidden_features, hidden_layers)

    out = mlp_forward(x, params)
    jax.block_until_ready(out)

    # Reference in plain JAX (same math) to verify kernel correctness.
    h = x.reshape(-1, in_features)
    for i, (w, b) in enumerate(params):
        h = h @ w + b
        if i != len(params) - 1:
            h = jnp.where(h >= 0, h, 0.1 * h)
    ref = h.reshape(2, 4, out_features)

    assert out.shape == (2, 4, out_features)
    assert jnp.allclose(out, ref, atol=1e-5, rtol=1e-5)

    print("KERNEL_OK")
</pallas_src>

<mosaic_0001>
module attributes {stable_mosaic.version = 11 : i64} {
  func.func @_fused_mlp_kernel(%arg0: i32, %arg1: memref<8x128xf32, #tpu.memory_space<vmem>>, %arg2: memref<128x128xf32, #tpu.memory_space<vmem>>, %arg3: memref<1x128xf32, #tpu.memory_space<vmem>>, %arg4: memref<128x128xf32, #tpu.memory_space<vmem>>, %arg5: memref<1x128xf32, #tpu.memory_space<vmem>>, %arg6: memref<128x128xf32, #tpu.memory_space<vmem>>, %arg7: memref<1x128xf32, #tpu.memory_space<vmem>>, %arg8: memref<8x128xf32, #tpu.memory_space<vmem>>) attributes {dimension_semantics = [#tpu.dimension_semantics<parallel>], iteration_bounds = array<i64: 1>, scalar_prefetch = 0 : i64, scratch_operands = 0 : i64, tpu.core_type = #tpu.core_type<tc>, window_params = [{transform_indices = @transform_0, window_bounds = array<i64: 8, 128>}, {pipeline_mode = #tpu.pipeline_mode<synchronous>, transform_indices = @transform_1, window_bounds = array<i64: 128, 128>}, {pipeline_mode = #tpu.pipeline_mode<synchronous>, transform_indices = @transform_2, window_bounds = array<i64: 1, 128>}, {pipeline_mode = #tpu.pipeline_mode<synchronous>, transform_indices = @transform_3, window_bounds = array<i64: 128, 128>}, {pipeline_mode = #tpu.pipeline_mode<synchronous>, transform_indices = @transform_4, window_bounds = array<i64: 1, 128>}, {pipeline_mode = #tpu.pipeline_mode<synchronous>, transform_indices = @transform_5, window_bounds = array<i64: 128, 128>}, {pipeline_mode = #tpu.pipeline_mode<synchronous>, transform_indices = @transform_6, window_bounds = array<i64: 1, 128>}, {transform_indices = @transform_7, window_bounds = array<i64: 8, 128>}]} {
    %c0 = arith.constant 0 : index
    %c0_0 = arith.constant 0 : index
    %0 = vector.load %arg1[%c0, %c0_0] : memref<8x128xf32, #tpu.memory_space<vmem>>, vector<8x128xf32>
    %c0_1 = arith.constant 0 : index
    %c0_2 = arith.constant 0 : index
    %1 = vector.load %arg2[%c0_1, %c0_2] : memref<128x128xf32, #tpu.memory_space<vmem>>, vector<128x128xf32>
    %c0_3 = arith.constant 0 : index
    %c0_4 = arith.constant 0 : index
    %2 = vector.load %arg3[%c0_3, %c0_4] : memref<1x128xf32, #tpu.memory_space<vmem>>, vector<1x128xf32>
    %cst = arith.constant dense<0.000000e+00> : vector<8x128xf32>
    %3 = tpu.matmul %0, %1, %cst {dimension_numbers = #tpu.dot_dimension_numbers<[1], [0], [0], [1], [0, 0, 1, 1], [], []>} : vector<8x128xf32>, vector<128x128xf32>, vector<8x128xf32> -> vector<8x128xf32>
    %4 = vector.broadcast %2 : vector<1x128xf32> to vector<8x128xf32>
    %5 = arith.addf %3, %4 : vector<8x128xf32>
    %cst_5 = arith.constant 0.000000e+00 : f32
    %6 = vector.broadcast %cst_5 : f32 to vector<8x128xf32>
    %7 = arith.cmpf oge, %5, %6 : vector<8x128xf32>
    %cst_6 = arith.constant 1.000000e-01 : f32
    %8 = vector.broadcast %cst_6 : f32 to vector<8x128xf32>
    %9 = arith.mulf %8, %5 : vector<8x128xf32>
    %10 = arith.select %7, %5, %9 : vector<8x128xi1>, vector<8x128xf32>
    %c0_7 = arith.constant 0 : index
    %c0_8 = arith.constant 0 : index
    %11 = vector.load %arg4[%c0_7, %c0_8] : memref<128x128xf32, #tpu.memory_space<vmem>>, vector<128x128xf32>
    %c0_9 = arith.constant 0 : index
    %c0_10 = arith.constant 0 : index
    %12 = vector.load %arg5[%c0_9, %c0_10] : memref<1x128xf32, #tpu.memory_space<vmem>>, vector<1x128xf32>
    %cst_11 = arith.constant dense<0.000000e+00> : vector<8x128xf32>
    %13 = tpu.matmul %10, %11, %cst_11 {dimension_numbers = #tpu.dot_dimension_numbers<[1], [0], [0], [1], [0, 0, 1, 1], [], []>} : vector<8x128xf32>, vector<128x128xf32>, vector<8x128xf32> -> vector<8x128xf32>
    %14 = vector.broadcast %12 : vector<1x128xf32> to vector<8x128xf32>
    %15 = arith.addf %13, %14 : vector<8x128xf32>
    %cst_12 = arith.constant 0.000000e+00 : f32
    %16 = vector.broadcast %cst_12 : f32 to vector<8x128xf32>
    %17 = arith.cmpf oge, %15, %16 : vector<8x128xf32>
    %cst_13 = arith.constant 1.000000e-01 : f32
    %18 = vector.broadcast %cst_13 : f32 to vector<8x128xf32>
    %19 = arith.mulf %18, %15 : vector<8x128xf32>
    %20 = arith.select %17, %15, %19 : vector<8x128xi1>, vector<8x128xf32>
    %c0_14 = arith.constant 0 : index
    %c0_15 = arith.constant 0 : index
    %21 = vector.load %arg6[%c0_14, %c0_15] : memref<128x128xf32, #tpu.memory_space<vmem>>, vector<128x128xf32>
    %c0_16 = arith.constant 0 : index
    %c0_17 = arith.constant 0 : index
    %22 = vector.load %arg7[%c0_16, %c0_17] : memref<1x128xf32, #tpu.memory_space<vmem>>, vector<1x128xf32>
    %cst_18 = arith.constant dense<0.000000e+00> : vector<8x128xf32>
    %23 = tpu.matmul %20, %21, %cst_18 {dimension_numbers = #tpu.dot_dimension_numbers<[1], [0], [0], [1], [0, 0, 1, 1], [], []>} : vector<8x128xf32>, vector<128x128xf32>, vector<8x128xf32> -> vector<8x128xf32>
    %24 = vector.broadcast %22 : vector<1x128xf32> to vector<8x128xf32>
    %25 = arith.addf %23, %24 : vector<8x128xf32>
    %c0_19 = arith.constant 0 : index
    %c0_20 = arith.constant 0 : index
    %26 = vector.load %arg8[%c0_19, %c0_20] : memref<8x128xf32, #tpu.memory_space<vmem>>, vector<8x128xf32>
    tpu.vector_store %arg8[%c0_19, %c0_20], %25 {strides = array<i32>} : memref<8x128xf32, #tpu.memory_space<vmem>>, vector<8x128xf32>,
    return
  }
  func.func @transform_0(%arg0: i32) -> (i32, i32) {
    %c0_i32 = arith.constant 0 : i32
    %c0_i32_0 = arith.constant 0 : i32
    return %arg0, %c0_i32 : i32, i32
  }
  func.func @transform_1(%arg0: i32) -> (i32, i32) {
    %c0_i32 = arith.constant 0 : i32
    %c0_i32_0 = arith.constant 0 : i32
    %c0_i32_1 = arith.constant 0 : i32
    return %c0_i32, %c0_i32_0 : i32, i32
  }
  func.func @transform_2(%arg0: i32) -> (i32, i32) {
    %c0_i32 = arith.constant 0 : i32
    %c0_i32_0 = arith.constant 0 : i32
    %c0_i32_1 = arith.constant 0 : i32
    return %c0_i32, %c0_i32_0 : i32, i32
  }
  func.func @transform_3(%arg0: i32) -> (i32, i32) {
    %c0_i32 = arith.constant 0 : i32
    %c0_i32_0 = arith.constant 0 : i32
    %c0_i32_1 = arith.constant 0 : i32
    return %c0_i32, %c0_i32_0 : i32, i32
  }
  func.func @transform_4(%arg0: i32) -> (i32, i32) {
    %c0_i32 = arith.constant 0 : i32
    %c0_i32_0 = arith.constant 0 : i32
    %c0_i32_1 = arith.constant 0 : i32
    return %c0_i32, %c0_i32_0 : i32, i32
  }
  func.func @transform_5(%arg0: i32) -> (i32, i32) {
    %c0_i32 = arith.constant 0 : i32
    %c0_i32_0 = arith.constant 0 : i32
    %c0_i32_1 = arith.constant 0 : i32
    return %c0_i32, %c0_i32_0 : i32, i32
  }
  func.func @transform_6(%arg0: i32) -> (i32, i32) {
    %c0_i32 = arith.constant 0 : i32
    %c0_i32_0 = arith.constant 0 : i32
    %c0_i32_1 = arith.constant 0 : i32
    return %c0_i32, %c0_i32_0 : i32, i32
  }
  func.func @transform_7(%arg0: i32) -> (i32, i32) {
    %c0_i32 = arith.constant 0 : i32
    %c0_i32_0 = arith.constant 0 : i32
    return %arg0, %c0_i32 : i32, i32
  }
}

</mosaic_0001>

<bundles_post_ra>
// kernel: tpu_custom_call.1
= control target key start
LH: loop header
LB: loop body
LE: loop exit
PB: predicated region body
PF: predicated region fallthrough
CT: control target
= control target key end

     0   :  { %12 = vsyncpa [#allocation3], 0  ;;  %s796_s0 = inlined_call_operand.hbm [shape: f32[8,128], index: 0, kind: input, shape index: {}]   ;;  %s797_s1 = inlined_call_operand.hbm [shape: f32[128,128], index: 1, kind: input, shape index: {}]   ;;  %s798_s2 = inlined_call_operand.vmem [shape: f32[1,128], index: 2, kind: input, shape index: {}]   ;;  %s799_s3 = inlined_call_operand.hbm [shape: f32[128,128], index: 3, kind: input, shape index: {}]   ;;  %s800_s4 = inlined_call_operand.vmem [shape: f32[1,128], index: 4, kind: input, shape index: {}]   ;;  %s801_s5 = inlined_call_operand.hbm [shape: f32[128,128], index: 5, kind: input, shape index: {}]   ;;  %s802_s6 = inlined_call_operand.vmem [shape: f32[1,128], index: 6, kind: input, shape index: {}]   ;;  %s803_s7 = inlined_call_operand.hbm [shape: f32[8,128], index: 7, kind: output, shape index: {}]  }
   0x1   :  { %13 = vsyncpa [#allocation6], 0 }
   0x2   :  { %14 = vsyncpa [#allocation9], 0 }
   0x3   :  { %15 = vsyncpa [#allocation4], 0  ;;  %s660_s24 = smov [#allocation5]  }
   0x4   :  { %s31_s25 = sshll.u32 %s660_s24, 4  ;;  %s32_s25 = int_to_ptr.vmem [resolvable:$true] %s31_s25 }
   0x5   :  { %s560_s26 = scalar_lea.vmem %s32_s25, 2048  ;;  %p565_p1 = scmp.lt.s32.totalorder %s32_s25, %s32_s25 }
   0x6   :  { %p561_p0 = scmp.ne.s32.totalorder %s32_s25, %s560_s26  ;;  %p566_p2 = scmp.lt.s32.totalorder %s560_s26, %s560_s26 }
   0x8   :  { %p567_p3 = por %p566_p2, %p565_p1 }
   0xa   :  { %p568_p4 = pnand %p567_p3, %p561_p0 }
   0xc   :  { %571 = shalt.err (!%p568_p4)
}
   0xd   :  { %s661_s27 = smov 128   ;;  %s662_s28 = smov 8  }
   0xe   :  { %37 = dma.hbm_to_vmem [thread:$0]  %s797_s1, 2048, %s32_s25, [#allocation6], %s661_s27, %s661_s27, %s662_s28  }
   0xf   :  { %s663_s8 = smov [#allocation2]   ;;  %s664_s10 = smov [#allocation7]  }
  0x10   :  { %s22_s9 = sshll.u32 %s663_s8, 4  ;;  %s45_s11 = sshll.u32 %s664_s10, 4  ;;  %s23_s9 = int_to_ptr.vmem [resolvable:$true] %s22_s9  ;;  %s46_s11 = int_to_ptr.vmem [resolvable:$true] %s45_s11 }
  0x11   :  { %s580_s12 = scalar_lea.vmem %s23_s9, 128  ;;  %p585_p6 = scmp.lt.s32.totalorder %s23_s9, %s23_s9 }
  0x12   :  { %p581_p5 = scmp.ne.s32.totalorder %s23_s9, %s580_s12  ;;  %p586_p7 = scmp.lt.s32.totalorder %s580_s12, %s580_s12 }
  0x14   :  { %p587_p8 = por %p586_p7, %p585_p6 }
  0x16   :  { %p588_p9 = pnand %p587_p8, %p581_p5 }
  0x18   :  { %591 = shalt.err (!%p588_p9)
}
  0x19   :  { %25 = dma.hbm_to_vmem [thread:$0]  %s796_s0, 128, %s23_s9, [#allocation3]  }
  0x1a   :  { %s600_s15 = scalar_lea.vmem %s46_s11, 2048  ;;  %p605_p11 = scmp.lt.s32.totalorder %s46_s11, %s46_s11 }
  0x1b   :  { %p601_p10 = scmp.ne.s32.totalorder %s46_s11, %s600_s15  ;;  %p606_p12 = scmp.lt.s32.totalorder %s600_s15, %s600_s15 }
  0x1d   :  { %p607_p13 = por %p606_p12, %p605_p11 }
  0x1f   :  { %p608_p0 = pnand %p607_p13, %p601_p10 }
  0x21   :  { %611 = shalt.err (!%p608_p0)
}
  0x22   :  { %51 = dma.hbm_to_vmem [thread:$0]  %s799_s3, 2048, %s46_s11, [#allocation6], %s661_s27, %s661_s27, %s662_s28  }
  0x23   :  { %s665_s17 = smov [#allocation8]  }
  0x24   :  { %s59_s18 = sshll.u32 %s665_s17, 4  ;;  %s60_s18 = int_to_ptr.vmem [resolvable:$true] %s59_s18 }
  0x25   :  { %s620_s19 = scalar_lea.vmem %s60_s18, 2048  ;;  %p625_p2 = scmp.lt.s32.totalorder %s60_s18, %s60_s18 }
  0x26   :  { %p621_p1 = scmp.ne.s32.totalorder %s60_s18, %s620_s19  ;;  %p626_p3 = scmp.lt.s32.totalorder %s620_s19, %s620_s19 }
  0x28   :  { %p627_p4 = por %p626_p3, %p625_p2 }
  0x2a   :  { %p628_p5 = pnand %p627_p4, %p621_p1 }
  0x2c   :  { %631 = shalt.err (!%p628_p5)
}
  0x2d   :  { %65 = dma.hbm_to_vmem [thread:$0]  %s801_s5, 2048, %s60_s18, [#allocation9], %s661_s27, %s661_s27, %s662_s28  }
  0x2e   :  { %652 = dma.done.wait [#allocation3], 128  }
  0x2f   :  { %653 = vsyncadd [#allocation3], 4294967168 }
  0x30   :  { %654 = dma.done.wait [#allocation6], 4096  }
  0x31   :  { %655 = vsyncadd [#allocation6], 4294963200 }
  0x32   :  { %656 = dma.done.wait [#allocation9], 2048  }
  0x33   :  { %657 = vsyncadd [#allocation9], 4294965248  ;;  %v666_v0 = vmov 0.0   ;;  %vm667_vm0 = vmmov 0   ;;  %v96_v1 = vld [vmem:[#allocation5 + $0x78] sm:$0xff]  ;;  %v95_v2 = vld [vmem:[#allocation5 + $0x70] sm:$0xff] }
  0x34   :  { %438 = vmatprep.subr.mxu0 %v666_v0  ;;  %470 = vmatprep.mubr.msk.f32.mxu0 %vm667_vm0, %v666_v0  ;;  %v94_v3 = vld [vmem:[#allocation5 + $0x68] sm:$0xff]  ;;  %v93_v4 = vld [vmem:[#allocation5 + $0x60] sm:$0xff]  ;;  %v192_v5 = vld [vmem:[#allocation7 + $0x78] sm:$0xff]  ;;  %s668_s24 = smov [#allocation10]  }
  0x35   :  { %473 = vmatprep.subr.mxu1 %v666_v0  ;;  %505 = vmatprep.mubr.msk.f32.mxu1 %vm667_vm0, %v666_v0  ;;  %v92_v6 = vld [vmem:[#allocation5 + $0x58] sm:$0xff]  ;;  %v191_v7 = vld [vmem:[#allocation7 + $0x70] sm:$0xff]  ;;  %v190_v8 = vld [vmem:[#allocation7 + $0x68] sm:$0xff]  ;;  %s373_s25 = sshll.u32 %s668_s24, 4  ;;  %s374_s25 = int_to_ptr.vmem [resolvable:$true] %s373_s25 }
  0x36   :  { %439 = vmatpush3.msra.mxu0 %v96_v1  ;;  %474 = vmatpush3.msra.mxu1 %v192_v5  ;;  %v91_v9 = vld [vmem:[#allocation5 + $0x50] sm:$0xff]  ;;  %v189_v10 = vld [vmem:[#allocation7 + $0x60] sm:$0xff]  ;;  %v90_v11 = vld [vmem:[#allocation5 + $0x48] sm:$0xff]  ;;  %s632_s26 = scalar_lea.vmem %s374_s25, 128  ;;  %p637_p7 = scmp.lt.s32.totalorder %s374_s25, %s374_s25 }
  0x37   :  { %440 = vmatprep.subr.mxu0 %v666_v0  ;;  %475 = vmatprep.subr.mxu1 %v666_v0  ;;  %v188_v12 = vld [vmem:[#allocation7 + $0x58] sm:$0xff]  ;;  %v89_v13 = vld [vmem:[#allocation5 + $0x40] sm:$0xff]  ;;  %v187_v14 = vld [vmem:[#allocation7 + $0x50] sm:$0xff]  ;;  %p633_p6 = scmp.ne.s32.totalorder %s374_s25, %s632_s26  ;;  %p638_p8 = scmp.lt.s32.totalorder %s632_s26, %s632_s26 }
  0x38   :  { %441 = vmatpush3.msra.mxu0 %v95_v2  ;;  %476 = vmatpush3.msra.mxu1 %v191_v7  ;;  %v88_v15 = vld [vmem:[#allocation5 + $0x38] sm:$0xff]  ;;  %v186_v16 = vld [vmem:[#allocation7 + $0x48] sm:$0xff]  ;;  %v87_v17 = vld [vmem:[#allocation5 + $0x30] sm:$0xff] }
  0x39   :  { %442 = vmatprep.subr.mxu0 %v666_v0  ;;  %477 = vmatprep.subr.mxu1 %v666_v0  ;;  %v185_v18 = vld [vmem:[#allocation7 + $0x40] sm:$0xff]  ;;  %v86_v19 = vld [vmem:[#allocation5 + $0x28] sm:$0xff]  ;;  %v184_v20 = vld [vmem:[#allocation7 + $0x38] sm:$0xff]  ;;  %p639_p9 = por %p638_p8, %p637_p7 }
  0x3a   :  { %443 = vmatpush3.msra.mxu0 %v94_v3  ;;  %478 = vmatpush3.msra.mxu1 %v190_v8  ;;  %v85_v21 = vld [vmem:[#allocation5 + $0x20] sm:$0xff]  ;;  %v183_v22 = vld [vmem:[#allocation7 + $0x30] sm:$0xff]  ;;  %v84_v23 = vld [vmem:[#allocation5 + $0x18] sm:$0xff] }
  0x3b   :  { %444 = vmatprep.subr.mxu0 %v666_v0  ;;  %479 = vmatprep.subr.mxu1 %v666_v0  ;;  %v182_v24 = vld [vmem:[#allocation7 + $0x28] sm:$0xff]  ;;  %v83_v25 = vld [vmem:[#allocation5 + $0x10] sm:$0xff]  ;;  %v181_v26 = vld [vmem:[#allocation7 + $0x20] sm:$0xff]  ;;  %p640_p10 = pnand %p639_p9, %p633_p6 }
  0x3c   :  { %445 = vmatpush3.msra.mxu0 %v93_v4  ;;  %480 = vmatpush3.msra.mxu1 %v189_v10  ;;  %v82_v27 = vld [vmem:[#allocation5 + $0x8] sm:$0xff]  ;;  %v180_v28 = vld [vmem:[#allocation7 + $0x18] sm:$0xff]  ;;  %v81_v29 = vld [vmem:[#allocation5] sm:$0xff] }
  0x3d   :  { %446 = vmatprep.subr.mxu0 %v666_v0  ;;  %481 = vmatprep.subr.mxu1 %v666_v0  ;;  %v80_v30 = vld [vmem:[#allocation2] sm:$0xff]  ;;  %v179_v31 = vld [vmem:[#allocation7 + $0x10] sm:$0xff]  ;;  %v178_v32 = vld [vmem:[#allocation7 + $0x8] sm:$0xff] }
  0x3e   :  { %447 = vmatpush3.msra.mxu0 %v92_v6  ;;  %482 = vmatpush3.msra.mxu1 %v188_v12  ;;  %v177_v33 = vld [vmem:[#allocation7] sm:$0xff]  ;;  %v288_v34 = vld [vmem:[#allocation8 + $0x78] sm:$0xff]  ;;  %v287_v35 = vld [vmem:[#allocation8 + $0x70] sm:$0xff] }
  0x3f   :  { %448 = vmatprep.subr.mxu0 %v666_v0  ;;  %483 = vmatprep.subr.mxu1 %v666_v0  ;;  %v286_v36 = vld [vmem:[#allocation8 + $0x68] sm:$0xff]  ;;  %v285_v37 = vld [vmem:[#allocation8 + $0x60] sm:$0xff]  ;;  %v284_v38 = vld [vmem:[#allocation8 + $0x58] sm:$0xff] }
  0x40   :  { %449 = vmatpush3.msra.mxu0 %v91_v9  ;;  %484 = vmatpush3.msra.mxu1 %v187_v14  ;;  %v283_v39 = vld [vmem:[#allocation8 + $0x50] sm:$0xff]  ;;  %v282_v40 = vld [vmem:[#allocation8 + $0x48] sm:$0xff]  ;;  %v281_v41 = vld [vmem:[#allocation8 + $0x40] sm:$0xff] }
  0x41   :  { %450 = vmatprep.subr.mxu0 %v666_v0  ;;  %485 = vmatprep.subr.mxu1 %v666_v0  ;;  %v280_v42 = vld [vmem:[#allocation8 + $0x38] sm:$0xff]  ;;  %v279_v43 = vld [vmem:[#allocation8 + $0x30] sm:$0xff]  ;;  %v278_v44 = vld [vmem:[#allocation8 + $0x28] sm:$0xff] }
  0x42   :  { %451 = vmatpush3.msra.mxu0 %v90_v11  ;;  %486 = vmatpush3.msra.mxu1 %v186_v16  ;;  %v277_v45 = vld [vmem:[#allocation8 + $0x20] sm:$0xff]  ;;  %v276_v46 = vld [vmem:[#allocation8 + $0x18] sm:$0xff]  ;;  %v275_v53 = vld [vmem:[#allocation8 + $0x10] sm:$0xff] }
  0x43   :  { %452 = vmatprep.subr.mxu0 %v666_v0  ;;  %487 = vmatprep.subr.mxu1 %v666_v0  ;;  %v384_v47 = vld [vmem:[%s798_s2] ss:$0 sm:$0xff]  ;;  %v274_v54 = vld [vmem:[#allocation8 + $0x8] sm:$0xff]  ;;  %v273_v55 = vld [vmem:[#allocation8] sm:$0xff] }
  0x44   :  { %453 = vmatpush3.msra.mxu0 %v89_v13  ;;  %488 = vmatpush3.msra.mxu1 %v185_v18  ;;  %v385_v56 = vld [vmem:[%s800_s4] ss:$0 sm:$0xff] }
  0x45   :  { %454 = vmatprep.subr.mxu0 %v666_v0  ;;  %489 = vmatprep.subr.mxu1 %v666_v0  ;;  %v386_v62 = vld [vmem:[%s802_s6] ss:$0 sm:$0xff] }
  0x46   :  { %455 = vmatpush3.msra.mxu0 %v88_v15  ;;  %490 = vmatpush3.msra.mxu1 %v184_v20 }
  0x47   :  { %456 = vmatprep.subr.mxu0 %v666_v0  ;;  %491 = vmatprep.subr.mxu1 %v666_v0 }
  0x48   :  { %457 = vmatpush3.msra.mxu0 %v87_v17  ;;  %492 = vmatpush3.msra.mxu1 %v183_v22 }
  0x49   :  { %458 = vmatprep.subr.mxu0 %v666_v0  ;;  %493 = vmatprep.subr.mxu1 %v666_v0 }
  0x4a   :  { %459 = vmatpush3.msra.mxu0 %v86_v19  ;;  %494 = vmatpush3.msra.mxu1 %v182_v24 }
  0x4b   :  { %460 = vmatprep.subr.mxu0 %v666_v0  ;;  %495 = vmatprep.subr.mxu1 %v666_v0 }
  0x4c   :  { %461 = vmatpush3.msra.mxu0 %v85_v21  ;;  %496 = vmatpush3.msra.mxu1 %v181_v26 }
  0x4d   :  { %462 = vmatprep.subr.mxu0 %v666_v0  ;;  %497 = vmatprep.subr.mxu1 %v666_v0 }
  0x4e   :  { %463 = vmatpush3.msra.mxu0 %v84_v23  ;;  %498 = vmatpush3.msra.mxu1 %v180_v28 }
  0x4f   :  { %464 = vmatprep.subr.mxu0 %v666_v0  ;;  %499 = vmatprep.subr.mxu1 %v666_v0 }
  0x50   :  { %465 = vmatpush3.msra.mxu0 %v83_v25  ;;  %500 = vmatpush3.msra.mxu1 %v179_v31 }
  0x51   :  { %466 = vmatprep.subr.mxu0 %v666_v0  ;;  %501 = vmatprep.subr.mxu1 %v666_v0 }
  0x52   :  { %467 = vmatpush3.msra.mxu0 %v82_v27  ;;  %502 = vmatpush3.msra.mxu1 %v178_v32 }
  0x53   :  { %468 = vmatprep.subr.mxu0 %v666_v0  ;;  %503 = vmatprep.subr.mxu1 %v666_v0 }
  0x54   :  { %469 = vmatpush3.msra.mxu0 %v81_v29  ;;  %504 = vmatpush3.msra.mxu1 %v177_v33 }
  0x55   :  { %471 = vmatmul.mubr.f32.vlgmr.msra.gmra.mxu0 %v80_v30  ;;  %508 = vmatprep.subr.mxu0 %v666_v0 }
  0x56   :  { %540 = vmatprep.mubr.msk.f32.mxu0 %vm667_vm0, %v666_v0  ;;  %509 = vmatpush3.msra.mxu0 %v288_v34 }
  0x57   :  { %510 = vmatprep.subr.mxu0 %v666_v0 }
  0x58   :  { %511 = vmatpush3.msra.mxu0 %v287_v35 }
  0x59   :  { %512 = vmatprep.subr.mxu0 %v666_v0 }
  0x5a   :  { %513 = vmatpush3.msra.mxu0 %v286_v36 }
  0x5b   :  { %514 = vmatprep.subr.mxu0 %v666_v0 }
  0x5c   :  { %515 = vmatpush3.msra.mxu0 %v285_v37 }
  0x5d   :  { %516 = vmatprep.subr.mxu0 %v666_v0 }
  0x5e   :  { %517 = vmatpush3.msra.mxu0 %v284_v38 }
  0x5f   :  { %518 = vmatprep.subr.mxu0 %v666_v0 }
  0x60   :  { %519 = vmatpush3.msra.mxu0 %v283_v39 }
  0x61   :  { %520 = vmatprep.subr.mxu0 %v666_v0 }
  0x62   :  { %521 = vmatpush3.msra.mxu0 %v282_v40 }
  0x63   :  { %522 = vmatprep.subr.mxu0 %v666_v0 }
  0x64   :  { %523 = vmatpush3.msra.mxu0 %v281_v41 }
  0x65   :  { %524 = vmatprep.subr.mxu0 %v666_v0 }
  0x66   :  { %525 = vmatpush3.msra.mxu0 %v280_v42 }
  0x67   :  { %526 = vmatprep.subr.mxu0 %v666_v0 }
  0x68   :  { %527 = vmatpush3.msra.mxu0 %v279_v43 }
  0x69   :  { %528 = vmatprep.subr.mxu0 %v666_v0 }
  0x6a   :  { %529 = vmatpush3.msra.mxu0 %v278_v44 }
  0x6b   :  { %530 = vmatprep.subr.mxu0 %v666_v0 }
  0x6c   :  { %531 = vmatpush3.msra.mxu0 %v277_v45 }
  0x6d   :  { %532 = vmatprep.subr.mxu0 %v666_v0 }
  0x6e   :  { %533 = vmatpush3.msra.mxu0 %v276_v46 }
  0x6f   :  { %534 = vmatprep.subr.mxu0 %v666_v0 }
  0x70   :  { %535 = vmatpush3.msra.mxu0 %v275_v53 }
  0x71   :  { %536 = vmatprep.subr.mxu0 %v666_v0 }
  0x72   :  { %537 = vmatpush3.msra.mxu0 %v274_v54 }
  0x73   :  { %538 = vmatprep.subr.mxu0 %v666_v0 }
  0x74   :  { %539 = vmatpush3.msra.mxu0 %v273_v55 }
 0x115   :  { %v170_v48 = vpop.f32.mrf.mxu0 }
 0x116   :  { %v171_v49 = vadd.f32 %v384_v47, %v170_v48 }
 0x117   :  { %v472_v50 = vpop.f32.mrf.mxu0 }
 0x118   :  { %v175_v51 = vmul.f32 0.1, %v171_v49  ;;  %vm174_vm1 = vcmp.ge.f32.partialorder %v171_v49, 0.0 }
 0x11a   :  { %v176_v52 = vsel %vm174_vm1, %v171_v49, %v175_v51 }
 0x11b   :  { %506 = vmatmul.mubr.f32.vlgmr.msra.gmra.mxu1 %v176_v52 }
 0x1db   :  { %v266_v57 = vpop.f32.mrf.mxu1 }
 0x1dc   :  { %v267_v58 = vadd.f32 %v385_v56, %v266_v57 }
 0x1dd   :  { %v507_v59 = vpop.f32.mrf.mxu1 }
 0x1de   :  { %vm270_vm2 = vcmp.ge.f32.partialorder %v267_v58, 0.0  ;;  %v271_v60 = vmul.f32 0.1, %v267_v58 }
 0x1e0   :  { %v272_v61 = vsel %vm270_vm2, %v267_v58, %v271_v60 }
 0x1e1   :  { %541 = vmatmul.mubr.f32.vlgmr.msra.gmra.mxu0 %v272_v61 }
 0x2a1   :  { %v362_v63 = vpop.f32.mrf.mxu0 }
 0x2a2   :  { %v363_v0 = vadd.f32 %v386_v62, %v362_v63 }
 0x2a3   :  { %v542_v1 = vpop.f32.mrf.mxu0 }
 0x2a4   :  { %366 = vst [vmem:[#allocation10] sm:$0xff] %v363_v0 }
 0x2a5   :  { %643 = shalt.err (!%p640_p10)
}
 0x2a6   :  { %376 = dma.vmem_to_hbm [thread:$0]  %s374_s25, 128, %s803_s7, [#allocation4]  }
 0x2a7   :  { %658 = dma.done.wait [#allocation4], 128  }
 0x2a8   :  { %659 = vsyncadd [#allocation4], 4294967168 }
 0x2a9   :  { %380 = vsyncpa [#allocation3], 1 }
 0x2aa   :  { %381 = vsyncpa [#allocation6], 1 }
 0x2ab   :  { %382 = vsyncpa [#allocation9], 1 }
 0x2ac   :  { %383 = vsyncpa [#allocation4], 1 }

</bundles_post_ra>
